<compile_context>
chip_gen: v6e
topology: v6e:2x2x1
jax: 0.10.0
libtpu: 0.0.40
codegen_flags: <defaults>
</compile_context>

<pallas_src>
import math

import jax
import jax.numpy as jnp
from jax.experimental import pallas as pl
from jax.experimental.pallas import tpu as pltpu

NEG_INF = float(jnp.finfo(jnp.float32).min)  # matches torch masked_fill_(finfo.min)
_K_CHUNK = 512  # chunk the (TB, K, A) tanh/reduce when K is long (bounds vreg live set)


def bahdanau_decoder_kernel(
    h0_ref, keyp_ref, val_ref, mask_ref,
    embp_r_ref, embp_z_ref, embp_n_ref,
    wq_ref, bq_ref, wo_ref,
    wih_r_ref, wih_z_ref, wih_n_ref,
    whh_r_ref, whh_z_ref, whh_n_ref, bhh_n_ref,
    whead_ref, bhead_ref,
    out_ref, hout_ref, attw_ref,
):
    h = h0_ref[...]                                   # (TB, H) f32, previous hidden = query
    mask = mask_ref[...]                              # (TB, K) f32

    # ---------------- Bahdanau attention energies ----------------
    # b_att_out is a uniform shift across the softmax axis -> mathematically a no-op, dropped.
    q_p = jnp.dot(h, wq_ref[...], preferred_element_type=jnp.float32) + bq_ref[...]   # (TB, A)
    wo = wo_ref[...]                                  # (1, A) lane vector

    K = keyp_ref.shape[1]
    if K > _K_CHUNK and K % _K_CHUNK == 0:
        # per-chunk tanh/reduce keeps the f32 (TB, KC, A) temp small; EUP tanh overlaps.
        parts = []
        for c in range(K // _K_CHUNK):
            kp = keyp_ref[:, c * _K_CHUNK:(c + 1) * _K_CHUNK, :].astype(jnp.float32)
            t = jnp.tanh(kp + q_p[:, None, :])
            parts.append(jnp.sum(t * wo, axis=-1))
        energy = jnp.concatenate(parts, axis=-1)       # (TB, K)
    else:
        kp = keyp_ref[...].astype(jnp.float32)         # bf16 stream -> f32 math (v5e safe)
        temp = jnp.tanh(kp + q_p[:, None, :])          # (TB, K, A)
        energy = jnp.sum(temp * wo, axis=-1)           # (TB, K)

    energy = jnp.where(mask == 0.0, NEG_INF, energy)

    # masked softmax over the encoder length (lane axis)
    m = jnp.max(energy, axis=-1, keepdims=True)
    p = jnp.exp(energy - m)
    s = jnp.sum(p, axis=-1, keepdims=True)
    attw = p * pl.reciprocal(s, approx=True)            # (TB, K)

    # context vector via VPU weighted sum (q=1 einsum would waste MXU rows)
    val = val_ref[...].astype(jnp.float32)               # (TB, K, D)
    cvec = jnp.sum(attw[:, :, None] * val, axis=1)       # (TB, D)

    # ---------------- GRU cell, per-gate weights (no sub-128 lane slices) ----------------
    # emb-side projection + b_ih (+ b_hh for r/z) are folded into embp_* in the wrapper.
    gi_r = jnp.dot(cvec, wih_r_ref[...], preferred_element_type=jnp.float32) + embp_r_ref[...]
    gi_z = jnp.dot(cvec, wih_z_ref[...], preferred_element_type=jnp.float32) + embp_z_ref[...]
    gi_n = jnp.dot(cvec, wih_n_ref[...], preferred_element_type=jnp.float32) + embp_n_ref[...]
    gh_r = jnp.dot(h, whh_r_ref[...], preferred_element_type=jnp.float32)
    gh_z = jnp.dot(h, whh_z_ref[...], preferred_element_type=jnp.float32)
    gh_n = jnp.dot(h, whh_n_ref[...], preferred_element_type=jnp.float32) + bhh_n_ref[...]
    r = jax.nn.sigmoid(gi_r + gh_r)
    z = jax.nn.sigmoid(gi_z + gh_z)
    n = jnp.tanh(gi_n + r * gh_n)
    hn = (1.0 - z) * n + z * h                            # (TB, H)

    # ---------------- output head ----------------
    out = jnp.dot(hn, whead_ref[...], preferred_element_type=jnp.float32) + bhead_ref[...]

    out_ref[...] = out.astype(out_ref.dtype)
    hout_ref[0] = hn.astype(hout_ref.dtype)               # written directly in (1, B, H) layout
    attw_ref[...] = attw.astype(attw_ref.dtype)


def _estimate_block_bytes(tile_b, K, A, D, H, OUT):
    """Conservative per-grid-step VMEM estimate (everything double-buffered)."""
    stream = tile_b * K * (A + D) * 2                     # bf16 key_p + value
    small = tile_b * (5 * H + 2 * K + OUT) * 4            # f32 per-row in/out blocks
    weights = (H * A + 2 * A + 3 * D * H + 3 * H * H + H + H * OUT + OUT) * 4
    return 2 * (stream + small) + 2 * weights


def _choose_tile_b(B, K, A, D, H, OUT, budget_bytes):
    """Largest layout-legal batch tile that fits the VMEM budget; prefer >=2 grid steps
    (so v7x's two TensorCores both get work via the 'parallel' batch axis)."""
    max_t = min(B, 512)
    cands = {t for t in range(8, max_t + 1, 8) if B % t == 0}
    if B <= 512:
        cands.add(B)            # whole-B block is always layout-legal (full-dim rule)
    if not cands:
        cands = {B}
    cands = sorted(cands)
    afford = [t for t in cands
              if _estimate_block_bytes(t, K, A, D, H, OUT) <= budget_bytes]
    if not afford:
        afford = [cands[0]]
    tile_b = max(afford)
    multi = [t for t in afford if B // t >= 2]
    if multi and max(multi) >= 8:
        tile_b = max(multi)
    return tile_b


def bahdanau_rnn_decoder_forward(dec_inputs, enc_seqs, enc_mask, dec_hstate, params):
    """Equivalent of BahdanauRNNDecoder.forward (GRU, num_layers=1, unidirectional).

    Returns (output_dec (B,1,OUT), last_hstate (1,B,H), attw (B,1,K)).
    """
    B, K, D = enc_seqs.shape
    H = params["w_hh"].shape[1]        # w_hh: (3H, H)
    A = params["w_key"].shape[0]       # w_key: (A, D)
    OUT = params["w_head"].shape[0]

    # ---- glue (plain JAX): token gather + layout squeezes ----
    tokens = dec_inputs.reshape(-1)                           # (B,)
    h0 = dec_hstate[-1]                                       # (B, H)
    mask2d = enc_mask.reshape(B, K).astype(jnp.float32)       # (B, K)

    # ---- decode-step-invariant encoder key projection (hoisted), streamed as bf16 ----
    key_p = (jnp.einsum('bkd,da->bka', enc_seqs, params["w_key"].T,
                        preferred_element_type=jnp.float32)
             + params["b_key"]).astype(jnp.bfloat16)          # (B, K, A)
    value = enc_seqs.astype(jnp.bfloat16)                     # (B, K, D)

    # ---- per-gate weight prep (PyTorch GRU gate order [r, z, n]; feature = [cvec | emb]) ----
    w_ih, w_hh = params["w_ih"], params["w_hh"]
    b_ih, b_hh = params["b_ih"], params["b_hh"]
    wih_r_t = w_ih[0:H, :D].T                                 # (D, H) cvec part, r gate
    wih_z_t = w_ih[H:2 * H, :D].T
    wih_n_t = w_ih[2 * H:3 * H, :D].T
    whh_r_t = w_hh[0:H].T                                     # (H, H)
    whh_z_t = w_hh[H:2 * H].T
    whh_n_t = w_hh[2 * H:3 * H].T
    bhh_n = b_hh[:, 2 * H:3 * H]                              # (1, H) must stay inside r*gh_n

    # embedding-side GRU projection folded into a gather table (decode-invariant);
    # biases that are additive before the gate nonlinearity are folded in too.
    emb_t = params["emb"]
    table_r = emb_t @ w_ih[0:H, D:].T + b_ih[:, 0:H] + b_hh[:, 0:H]
    table_z = emb_t @ w_ih[H:2 * H, D:].T + b_ih[:, H:2 * H] + b_hh[:, H:2 * H]
    table_n = emb_t @ w_ih[2 * H:3 * H, D:].T + b_ih[:, 2 * H:3 * H]
    embp_r = table_r[tokens]                                  # (B, H)
    embp_z = table_z[tokens]
    embp_n = table_n[tokens]

    w_query_t = params["w_query"].T                           # (H, A)
    b_query = params["b_query"]                               # (1, A)
    w_aout = params["w_att_out"]                              # (1, A) lane vector
    w_head_t = params["w_head"].T                             # (H, OUT)
    b_head = params["b_head"]                                 # (1, OUT)

    # ---- VMEM-aware batch tiling + explicit scoped-VMEM limit ----
    budget = 36 * 1024 * 1024                                 # safe under v7x 64 MiB physical
    tile_b = _choose_tile_b(B, K, A, D, H, OUT, budget)
    nb = B // tile_b
    est = _estimate_block_bytes(tile_b, K, A, D, H, OUT)
    vmem_limit = int(min(48 * 1024 * 1024, max(32 * 1024 * 1024, 1.5 * est)))

    def wspec(a):
        zeros = (0,) * a.ndim
        return pl.BlockSpec(a.shape, lambda b, z=zeros: z)

    in_specs = [
        pl.BlockSpec((tile_b, H), lambda b: (b, 0)),          # h0
        pl.BlockSpec((tile_b, K, A), lambda b: (b, 0, 0)),    # key_p (bf16)
        pl.BlockSpec((tile_b, K, D), lambda b: (b, 0, 0)),    # value (bf16)
        pl.BlockSpec((tile_b, K), lambda b: (b, 0)),          # mask
        pl.BlockSpec((tile_b, H), lambda b: (b, 0)),          # embp_r
        pl.BlockSpec((tile_b, H), lambda b: (b, 0)),          # embp_z
        pl.BlockSpec((tile_b, H), lambda b: (b, 0)),          # embp_n
        wspec(w_query_t), wspec(b_query), wspec(w_aout),
        wspec(wih_r_t), wspec(wih_z_t), wspec(wih_n_t),
        wspec(whh_r_t), wspec(whh_z_t), wspec(whh_n_t), wspec(bhh_n),
        wspec(w_head_t), wspec(b_head),
    ]
    # TODO(synk): if real OUT/K are >=128, pad the output lane dims to multiples of 128
    # (and slice in the wrapper) so these stores become unmasked vst.
    out_specs = (
        pl.BlockSpec((tile_b, OUT), lambda b: (b, 0)),        # output_dec (sublane-dense)
        pl.BlockSpec((1, tile_b, H), lambda b: (0, b, 0)),    # last_hstate, already (1,B,H)
        pl.BlockSpec((tile_b, K), lambda b: (b, 0)),          # attention weights
    )
    out_shape = (
        jax.ShapeDtypeStruct((B, OUT), jnp.float32),
        jax.ShapeDtypeStruct((1, B, H), jnp.float32),
        jax.ShapeDtypeStruct((B, K), jnp.float32),
    )

    out2d, last_hstate, attw2d = pl.pallas_call(
        bahdanau_decoder_kernel,
        out_shape=out_shape,
        grid=(nb,),
        in_specs=in_specs,
        out_specs=out_specs,
        compiler_params=pltpu.CompilerParams(
            dimension_semantics=("parallel",),
            vmem_limit_bytes=vmem_limit),
    )(
        h0, key_p, value, mask2d,
        embp_r, embp_z, embp_n,
        w_query_t, b_query, w_aout,
        wih_r_t, wih_z_t, wih_n_t,
        whh_r_t, whh_z_t, whh_n_t, bhh_n,
        w_head_t, b_head,
    )

    output_dec = out2d.reshape(B, 1, OUT)
    attw = attw2d.reshape(B, 1, K)
    return output_dec, last_hstate, attw


def init_params(key, *, num_embeddings, emb_channels, hidden, in_channels,
                att_dim, out_channels, padding_idx=0):
    """Deterministic synthetic parameters mirroring BahdanauRNNDecoder's init.

    PyTorch weight layouts are kept: Linear/GRU weights are (out_features, in_features);
    biases are stored as (1, N). GRU input size = in_channels + emb_channels.
    """
    keys = jax.random.split(key, 12)

    # Embedding: normal(0, emb_channels^-0.5), padding row zeroed.
    emb = jax.random.normal(keys[0], (num_embeddings, emb_channels),
                            dtype=jnp.float32) * (emb_channels ** -0.5)
    emb = emb.at[padding_idx].set(0.0)

    # GRU: U(-1/sqrt(H), 1/sqrt(H)), gate order [r, z, n], input = [cvec | emb].
    gru_in = in_channels + emb_channels
    k = 1.0 / math.sqrt(hidden)
    w_ih = jax.random.uniform(keys[1], (3 * hidden, gru_in), minval=-k, maxval=k)
    w_hh = jax.random.uniform(keys[2], (3 * hidden, hidden), minval=-k, maxval=k)
    b_ih = jax.random.uniform(keys[3], (1, 3 * hidden), minval=-k, maxval=k)
    b_hh = jax.random.uniform(keys[4], (1, 3 * hidden), minval=-k, maxval=k)

    # Bahdanau attention linears (add_bias=True): default Linear-style uniform init.
    def lin(kw, kb, out_f, in_f):
        bound = 1.0 / math.sqrt(in_f)
        w = jax.random.uniform(kw, (out_f, in_f), minval=-bound, maxval=bound)
        b = jax.random.uniform(kb, (1, out_f), minval=-bound, maxval=bound)
        return w, b

    w_key, b_key = lin(keys[5], keys[6], att_dim, in_channels)
    w_query, b_query = lin(keys[7], keys[8], att_dim, hidden)
    w_att_out, b_att_out = lin(keys[9], keys[10], 1, att_dim)

    # Head: Linear(hidden, out_channels), xavier_uniform weight, zero bias.
    bound = math.sqrt(6.0 / (hidden + out_channels))
    w_head = jax.random.uniform(keys[11], (out_channels, hidden),
                                minval=-bound, maxval=bound)
    b_head = jnp.zeros((1, out_channels), dtype=jnp.float32)

    return dict(
        emb=emb.astype(jnp.float32),
        w_ih=w_ih.astype(jnp.float32), w_hh=w_hh.astype(jnp.float32),
        b_ih=b_ih.astype(jnp.float32), b_hh=b_hh.astype(jnp.float32),
        w_key=w_key.astype(jnp.float32), b_key=b_key.astype(jnp.float32),
        w_query=w_query.astype(jnp.float32), b_query=b_query.astype(jnp.float32),
        w_att_out=w_att_out.astype(jnp.float32), b_att_out=b_att_out.astype(jnp.float32),
        w_head=w_head.astype(jnp.float32), b_head=b_head.astype(jnp.float32),
    )


if __name__ == "__main__":
    # Small shapes consistent with the module: bahdanau decoder, GRU, num_layers=1.
    B, K = 2, 8                       # batch, encoder length
    IN = HID = OUT_C = ATT = 32       # in/hidden/out/att channels (module ties them)
    E = 4                             # emb_channels
    NUM_EMB = OUT_C                   # num_embeddings = out_channels (post_init)

    key = jax.random.PRNGKey(0)
    k_tok, k_enc, k_h, k_params = jax.random.split(key, 4)

    params = init_params(k_params, num_embeddings=NUM_EMB, emb_channels=E,
                         hidden=HID, in_channels=IN, att_dim=ATT,
                         out_channels=OUT_C, padding_idx=0)

    dec_inputs = jax.random.randint(k_tok, (B, 1), 0, NUM_EMB)          # one decode step
    enc_seqs = jax.random.normal(k_enc, (B, K, IN), dtype=jnp.float32)
    enc_mask = jnp.ones((B, K), dtype=jnp.int32).at[1, 5:].set(0)       # pad tail of item 1
    enc_hstate = jax.random.normal(k_h, (1, B, HID), dtype=jnp.float32)
    dec_hstate = enc_hstate  # init_dec_hstate(enc_hstate, init_as_zero=False)

    # TODO(synk): GRU inter-layer dropout is inactive here (num_layers=1 / eval mode).
    out, last_h, attw = bahdanau_rnn_decoder_forward(
        dec_inputs, enc_seqs, enc_mask, dec_hstate, params)
    jax.block_until_ready(out)

    assert out.shape == (B, 1, OUT_C)
    assert last_h.shape == (1, B, HID)
    assert attw.shape == (B, 1, K)
    print("KERNEL_OK")
</pallas_src>

<mosaic_0001>
module attributes {stable_mosaic.version = 11 : i64} {
  func.func @bahdanau_decoder_kernel(%arg0: i32, %arg1: memref<2x32xf32, #tpu.memory_space<vmem>>, %arg2: memref<2x8x32xbf16, #tpu.memory_space<vmem>>, %arg3: memref<2x8x32xbf16, #tpu.memory_space<vmem>>, %arg4: memref<2x8xf32, #tpu.memory_space<vmem>>, %arg5: memref<2x32xf32, #tpu.memory_space<vmem>>, %arg6: memref<2x32xf32, #tpu.memory_space<vmem>>, %arg7: memref<2x32xf32, #tpu.memory_space<vmem>>, %arg8: memref<32x32xf32, #tpu.memory_space<vmem>>, %arg9: memref<1x32xf32, #tpu.memory_space<vmem>>, %arg10: memref<1x32xf32, #tpu.memory_space<vmem>>, %arg11: memref<32x32xf32, #tpu.memory_space<vmem>>, %arg12: memref<32x32xf32, #tpu.memory_space<vmem>>, %arg13: memref<32x32xf32, #tpu.memory_space<vmem>>, %arg14: memref<32x32xf32, #tpu.memory_space<vmem>>, %arg15: memref<32x32xf32, #tpu.memory_space<vmem>>, %arg16: memref<32x32xf32, #tpu.memory_space<vmem>>, %arg17: memref<1x32xf32, #tpu.memory_space<vmem>>, %arg18: memref<32x32xf32, #tpu.memory_space<vmem>>, %arg19: memref<1x32xf32, #tpu.memory_space<vmem>>, %arg20: memref<2x32xf32, #tpu.memory_space<vmem>>, %arg21: memref<1x2x32xf32, #tpu.memory_space<vmem>>, %arg22: memref<2x8xf32, #tpu.memory_space<vmem>>) attributes {dimension_semantics = [#tpu.dimension_semantics<parallel>], iteration_bounds = array<i64: 1>, scalar_prefetch = 0 : i64, scratch_operands = 0 : i64, tpu.core_type = #tpu.core_type<tc>, window_params = [{transform_indices = @transform_0, window_bounds = array<i64: 2, 32>}, {transform_indices = @transform_1, window_bounds = array<i64: 2, 8, 32>}, {transform_indices = @transform_2, window_bounds = array<i64: 2, 8, 32>}, {transform_indices = @transform_3, window_bounds = array<i64: 2, 8>}, {transform_indices = @transform_4, window_bounds = array<i64: 2, 32>}, {transform_indices = @transform_5, window_bounds = array<i64: 2, 32>}, {transform_indices = @transform_6, window_bounds = array<i64: 2, 32>}, {pipeline_mode = #tpu.pipeline_mode<synchronous>, transform_indices = @transform_7, window_bounds = array<i64: 32, 32>}, {pipeline_mode = #tpu.pipeline_mode<synchronous>, transform_indices = @transform_8, window_bounds = array<i64: 1, 32>}, {pipeline_mode = #tpu.pipeline_mode<synchronous>, transform_indices = @transform_9, window_bounds = array<i64: 1, 32>}, {pipeline_mode = #tpu.pipeline_mode<synchronous>, transform_indices = @transform_10, window_bounds = array<i64: 32, 32>}, {pipeline_mode = #tpu.pipeline_mode<synchronous>, transform_indices = @transform_11, window_bounds = array<i64: 32, 32>}, {pipeline_mode = #tpu.pipeline_mode<synchronous>, transform_indices = @transform_12, window_bounds = array<i64: 32, 32>}, {pipeline_mode = #tpu.pipeline_mode<synchronous>, transform_indices = @transform_13, window_bounds = array<i64: 32, 32>}, {pipeline_mode = #tpu.pipeline_mode<synchronous>, transform_indices = @transform_14, window_bounds = array<i64: 32, 32>}, {pipeline_mode = #tpu.pipeline_mode<synchronous>, transform_indices = @transform_15, window_bounds = array<i64: 32, 32>}, {pipeline_mode = #tpu.pipeline_mode<synchronous>, transform_indices = @transform_16, window_bounds = array<i64: 1, 32>}, {pipeline_mode = #tpu.pipeline_mode<synchronous>, transform_indices = @transform_17, window_bounds = array<i64: 32, 32>}, {pipeline_mode = #tpu.pipeline_mode<synchronous>, transform_indices = @transform_18, window_bounds = array<i64: 1, 32>}, {transform_indices = @transform_19, window_bounds = array<i64: 2, 32>}, {transform_indices = @transform_20, window_bounds = array<i64: 1, 2, 32>}, {transform_indices = @transform_21, window_bounds = array<i64: 2, 8>}]} {
    %c0 = arith.constant 0 : index
    %c0_0 = arith.constant 0 : index
    %0 = vector.load %arg1[%c0, %c0_0] : memref<2x32xf32, #tpu.memory_space<vmem>>, vector<2x32xf32>
    %c0_1 = arith.constant 0 : index
    %c0_2 = arith.constant 0 : index
    %1 = vector.load %arg4[%c0_1, %c0_2] : memref<2x8xf32, #tpu.memory_space<vmem>>, vector<2x8xf32>
    %c0_3 = arith.constant 0 : index
    %c0_4 = arith.constant 0 : index
    %2 = vector.load %arg8[%c0_3, %c0_4] : memref<32x32xf32, #tpu.memory_space<vmem>>, vector<32x32xf32>
    %cst = arith.constant dense<0.000000e+00> : vector<2x32xf32>
    %3 = tpu.matmul %0, %2, %cst {dimension_numbers = #tpu.dot_dimension_numbers<[1], [0], [0], [1], [0, 0, 1, 1], [], []>} : vector<2x32xf32>, vector<32x32xf32>, vector<2x32xf32> -> vector<2x32xf32>
    %c0_5 = arith.constant 0 : index
    %c0_6 = arith.constant 0 : index
    %4 = vector.load %arg9[%c0_5, %c0_6] : memref<1x32xf32, #tpu.memory_space<vmem>>, vector<1x32xf32>
    %5 = vector.broadcast %4 : vector<1x32xf32> to vector<2x32xf32>
    %6 = arith.addf %3, %5 : vector<2x32xf32>
    %c0_7 = arith.constant 0 : index
    %c0_8 = arith.constant 0 : index
    %7 = vector.load %arg10[%c0_7, %c0_8] : memref<1x32xf32, #tpu.memory_space<vmem>>, vector<1x32xf32>
    %c0_9 = arith.constant 0 : index
    %c0_10 = arith.constant 0 : index
    %c0_11 = arith.constant 0 : index
    %8 = vector.load %arg2[%c0_9, %c0_10, %c0_11] : memref<2x8x32xbf16, #tpu.memory_space<vmem>>, vector<2x8x32xbf16>
    %9 = arith.extf %8 : vector<2x8x32xbf16> to vector<2x8x32xf32>
    %10 = vector.shape_cast %6 : vector<2x32xf32> to vector<2x1x32xf32>
    %11 = vector.broadcast %10 : vector<2x1x32xf32> to vector<2x8x32xf32>
    %12 = arith.addf %9, %11 : vector<2x8x32xf32>
    %13 = math.tanh %12 : vector<2x8x32xf32>
    %14 = vector.shape_cast %7 : vector<1x32xf32> to vector<1x1x32xf32>
    %15 = vector.broadcast %14 : vector<1x1x32xf32> to vector<2x8x32xf32>
    %16 = arith.mulf %13, %15 : vector<2x8x32xf32>
    %cst_12 = arith.constant dense<0.000000e+00> : vector<2x8xf32>
    %17 = vector.multi_reduction <add>, %16, %cst_12 [2] : vector<2x8x32xf32> to vector<2x8xf32>
    %cst_13 = arith.constant 0.000000e+00 : f32
    %18 = vector.broadcast %cst_13 : f32 to vector<2x8xf32>
    %19 = arith.cmpf oeq, %1, %18 : vector<2x8xf32>
    %cst_14 = arith.constant -3.40282347E+38 : f32
    %20 = vector.broadcast %cst_14 : f32 to vector<2x8xf32>
    %21 = arith.select %19, %20, %17 : vector<2x8xi1>, vector<2x8xf32>
    %cst_15 = arith.constant dense<0xFF800000> : vector<2xf32>
    %22 = vector.multi_reduction <maximumf>, %21, %cst_15 [1] : vector<2x8xf32> to vector<2xf32>
    %23 = vector.shape_cast %22 : vector<2xf32> to vector<2x1xf32>
    %24 = vector.broadcast %23 : vector<2x1xf32> to vector<2x8xf32>
    %25 = arith.subf %21, %24 : vector<2x8xf32>
    %26 = math.exp %25 : vector<2x8xf32>
    %cst_16 = arith.constant dense<0.000000e+00> : vector<2xf32>
    %27 = vector.multi_reduction <add>, %26, %cst_16 [1] : vector<2x8xf32> to vector<2xf32>
    %28 = vector.shape_cast %27 : vector<2xf32> to vector<2x1xf32>
    %29 = tpu.reciprocal %28 {approx = true} : vector<2x1xf32> -> vector<2x1xf32>
    %30 = vector.broadcast %29 : vector<2x1xf32> to vector<2x8xf32>
    %31 = arith.mulf %26, %30 : vector<2x8xf32>
    %c0_17 = arith.constant 0 : index
    %c0_18 = arith.constant 0 : index
    %c0_19 = arith.constant 0 : index
    %32 = vector.load %arg3[%c0_17, %c0_18, %c0_19] : memref<2x8x32xbf16, #tpu.memory_space<vmem>>, vector<2x8x32xbf16>
    %33 = arith.extf %32 : vector<2x8x32xbf16> to vector<2x8x32xf32>
    %34 = vector.shape_cast %31 : vector<2x8xf32> to vector<2x8x1xf32>
    %35 = vector.broadcast %34 : vector<2x8x1xf32> to vector<2x8x32xf32>
    %36 = arith.mulf %35, %33 : vector<2x8x32xf32>
    %cst_20 = arith.constant dense<0.000000e+00> : vector<2x32xf32>
    %37 = vector.multi_reduction <add>, %36, %cst_20 [1] : vector<2x8x32xf32> to vector<2x32xf32>
    %c0_21 = arith.constant 0 : index
    %c0_22 = arith.constant 0 : index
    %38 = vector.load %arg11[%c0_21, %c0_22] : memref<32x32xf32, #tpu.memory_space<vmem>>, vector<32x32xf32>
    %cst_23 = arith.constant dense<0.000000e+00> : vector<2x32xf32>
    %39 = tpu.matmul %37, %38, %cst_23 {dimension_numbers = #tpu.dot_dimension_numbers<[1], [0], [0], [1], [0, 0, 1, 1], [], []>} : vector<2x32xf32>, vector<32x32xf32>, vector<2x32xf32> -> vector<2x32xf32>
    %c0_24 = arith.constant 0 : index
    %c0_25 = arith.constant 0 : index
    %40 = vector.load %arg5[%c0_24, %c0_25] : memref<2x32xf32, #tpu.memory_space<vmem>>, vector<2x32xf32>
    %41 = arith.addf %39, %40 : vector<2x32xf32>
    %c0_26 = arith.constant 0 : index
    %c0_27 = arith.constant 0 : index
    %42 = vector.load %arg12[%c0_26, %c0_27] : memref<32x32xf32, #tpu.memory_space<vmem>>, vector<32x32xf32>
    %cst_28 = arith.constant dense<0.000000e+00> : vector<2x32xf32>
    %43 = tpu.matmul %37, %42, %cst_28 {dimension_numbers = #tpu.dot_dimension_numbers<[1], [0], [0], [1], [0, 0, 1, 1], [], []>} : vector<2x32xf32>, vector<32x32xf32>, vector<2x32xf32> -> vector<2x32xf32>
    %c0_29 = arith.constant 0 : index
    %c0_30 = arith.constant 0 : index
    %44 = vector.load %arg6[%c0_29, %c0_30] : memref<2x32xf32, #tpu.memory_space<vmem>>, vector<2x32xf32>
    %45 = arith.addf %43, %44 : vector<2x32xf32>
    %c0_31 = arith.constant 0 : index
    %c0_32 = arith.constant 0 : index
    %46 = vector.load %arg13[%c0_31, %c0_32] : memref<32x32xf32, #tpu.memory_space<vmem>>, vector<32x32xf32>
    %cst_33 = arith.constant dense<0.000000e+00> : vector<2x32xf32>
    %47 = tpu.matmul %37, %46, %cst_33 {dimension_numbers = #tpu.dot_dimension_numbers<[1], [0], [0], [1], [0, 0, 1, 1], [], []>} : vector<2x32xf32>, vector<32x32xf32>, vector<2x32xf32> -> vector<2x32xf32>
    %c0_34 = arith.constant 0 : index
    %c0_35 = arith.constant 0 : index
    %48 = vector.load %arg7[%c0_34, %c0_35] : memref<2x32xf32, #tpu.memory_space<vmem>>, vector<2x32xf32>
    %49 = arith.addf %47, %48 : vector<2x32xf32>
    %c0_36 = arith.constant 0 : index
    %c0_37 = arith.constant 0 : index
    %50 = vector.load %arg14[%c0_36, %c0_37] : memref<32x32xf32, #tpu.memory_space<vmem>>, vector<32x32xf32>
    %cst_38 = arith.constant dense<0.000000e+00> : vector<2x32xf32>
    %51 = tpu.matmul %0, %50, %cst_38 {dimension_numbers = #tpu.dot_dimension_numbers<[1], [0], [0], [1], [0, 0, 1, 1], [], []>} : vector<2x32xf32>, vector<32x32xf32>, vector<2x32xf32> -> vector<2x32xf32>
    %c0_39 = arith.constant 0 : index
    %c0_40 = arith.constant 0 : index
    %52 = vector.load %arg15[%c0_39, %c0_40] : memref<32x32xf32, #tpu.memory_space<vmem>>, vector<32x32xf32>
    %cst_41 = arith.constant dense<0.000000e+00> : vector<2x32xf32>
    %53 = tpu.matmul %0, %52, %cst_41 {dimension_numbers = #tpu.dot_dimension_numbers<[1], [0], [0], [1], [0, 0, 1, 1], [], []>} : vector<2x32xf32>, vector<32x32xf32>, vector<2x32xf32> -> vector<2x32xf32>
    %c0_42 = arith.constant 0 : index
    %c0_43 = arith.constant 0 : index
    %54 = vector.load %arg16[%c0_42, %c0_43] : memref<32x32xf32, #tpu.memory_space<vmem>>, vector<32x32xf32>
    %cst_44 = arith.constant dense<0.000000e+00> : vector<2x32xf32>
    %55 = tpu.matmul %0, %54, %cst_44 {dimension_numbers = #tpu.dot_dimension_numbers<[1], [0], [0], [1], [0, 0, 1, 1], [], []>} : vector<2x32xf32>, vector<32x32xf32>, vector<2x32xf32> -> vector<2x32xf32>
    %c0_45 = arith.constant 0 : index
    %c0_46 = arith.constant 0 : index
    %56 = vector.load %arg17[%c0_45, %c0_46] : memref<1x32xf32, #tpu.memory_space<vmem>>, vector<1x32xf32>
    %57 = vector.broadcast %56 : vector<1x32xf32> to vector<2x32xf32>
    %58 = arith.addf %55, %57 : vector<2x32xf32>
    %59 = arith.addf %41, %51 : vector<2x32xf32>
    %60 = arith.negf %59 : vector<2x32xf32>
    %61 = math.exp %60 : vector<2x32xf32>
    %cst_47 = arith.constant 1.000000e+00 : f32
    %62 = vector.broadcast %cst_47 : f32 to vector<2x32xf32>
    %63 = arith.addf %62, %61 : vector<2x32xf32>
    %64 = arith.divf %62, %63 : vector<2x32xf32>
    %65 = arith.addf %45, %53 : vector<2x32xf32>
    %66 = arith.negf %65 : vector<2x32xf32>
    %67 = math.exp %66 : vector<2x32xf32>
    %cst_48 = arith.constant 1.000000e+00 : f32
    %68 = vector.broadcast %cst_48 : f32 to vector<2x32xf32>
    %69 = arith.addf %68, %67 : vector<2x32xf32>
    %70 = arith.divf %68, %69 : vector<2x32xf32>
    %71 = arith.mulf %64, %58 : vector<2x32xf32>
    %72 = arith.addf %49, %71 : vector<2x32xf32>
    %73 = math.tanh %72 : vector<2x32xf32>
    %cst_49 = arith.constant 1.000000e+00 : f32
    %74 = vector.broadcast %cst_49 : f32 to vector<2x32xf32>
    %75 = arith.subf %74, %70 : vector<2x32xf32>
    %76 = arith.mulf %75, %73 : vector<2x32xf32>
    %77 = arith.mulf %70, %0 : vector<2x32xf32>
    %78 = arith.addf %76, %77 : vector<2x32xf32>
    %c0_50 = arith.constant 0 : index
    %c0_51 = arith.constant 0 : index
    %79 = vector.load %arg18[%c0_50, %c0_51] : memref<32x32xf32, #tpu.memory_space<vmem>>, vector<32x32xf32>
    %cst_52 = arith.constant dense<0.000000e+00> : vector<2x32xf32>
    %80 = tpu.matmul %78, %79, %cst_52 {dimension_numbers = #tpu.dot_dimension_numbers<[1], [0], [0], [1], [0, 0, 1, 1], [], []>} : vector<2x32xf32>, vector<32x32xf32>, vector<2x32xf32> -> vector<2x32xf32>
    %c0_53 = arith.constant 0 : index
    %c0_54 = arith.constant 0 : index
    %81 = vector.load %arg19[%c0_53, %c0_54] : memref<1x32xf32, #tpu.memory_space<vmem>>, vector<1x32xf32>
    %82 = vector.broadcast %81 : vector<1x32xf32> to vector<2x32xf32>
    %83 = arith.addf %80, %82 : vector<2x32xf32>
    %c0_55 = arith.constant 0 : index
    %c0_56 = arith.constant 0 : index
    %84 = vector.load %arg20[%c0_55, %c0_56] : memref<2x32xf32, #tpu.memory_space<vmem>>, vector<2x32xf32>
    tpu.vector_store %arg20[%c0_55, %c0_56], %83 {strides = array<i32>} : memref<2x32xf32, #tpu.memory_space<vmem>>, vector<2x32xf32>,
    %c0_57 = arith.constant 0 : index
    %c0_58 = arith.constant 0 : index
    %c0_59 = arith.constant 0 : index
    %85 = vector.load %arg21[%c0_57, %c0_58, %c0_59] : memref<1x2x32xf32, #tpu.memory_space<vmem>>, vector<1x2x32xf32>
    %86 = vector.shape_cast %85 : vector<1x2x32xf32> to vector<2x32xf32>
    %87 = vector.shape_cast %78 : vector<2x32xf32> to vector<1x2x32xf32>
    tpu.vector_store %arg21[%c0_57, %c0_58, %c0_59], %87 {strides = array<i32>} : memref<1x2x32xf32, #tpu.memory_space<vmem>>, vector<1x2x32xf32>,
    %c0_60 = arith.constant 0 : index
    %c0_61 = arith.constant 0 : index
    %88 = vector.load %arg22[%c0_60, %c0_61] : memref<2x8xf32, #tpu.memory_space<vmem>>, vector<2x8xf32>
    tpu.vector_store %arg22[%c0_60, %c0_61], %31 {strides = array<i32>} : memref<2x8xf32, #tpu.memory_space<vmem>>, vector<2x8xf32>,
    return
  }
  func.func @transform_0(%arg0: i32) -> (i32, i32) {
    %c0_i32 = arith.constant 0 : i32
    %c0_i32_0 = arith.constant 0 : i32
    return %arg0, %c0_i32 : i32, i32
  }
  func.func @transform_1(%arg0: i32) -> (i32, i32, i32) {
    %c0_i32 = arith.constant 0 : i32
    %c0_i32_0 = arith.constant 0 : i32
    %c0_i32_1 = arith.constant 0 : i32
    return %arg0, %c0_i32, %c0_i32_0 : i32, i32, i32
  }
  func.func @transform_2(%arg0: i32) -> (i32, i32, i32) {
    %c0_i32 = arith.constant 0 : i32
    %c0_i32_0 = arith.constant 0 : i32
    %c0_i32_1 = arith.constant 0 : i32
    return %arg0, %c0_i32, %c0_i32_0 : i32, i32, i32
  }
  func.func @transform_3(%arg0: i32) -> (i32, i32) {
    %c0_i32 = arith.constant 0 : i32
    %c0_i32_0 = arith.constant 0 : i32
    return %arg0, %c0_i32 : i32, i32
  }
  func.func @transform_4(%arg0: i32) -> (i32, i32) {
    %c0_i32 = arith.constant 0 : i32
    %c0_i32_0 = arith.constant 0 : i32
    return %arg0, %c0_i32 : i32, i32
  }
  func.func @transform_5(%arg0: i32) -> (i32, i32) {
    %c0_i32 = arith.constant 0 : i32
    %c0_i32_0 = arith.constant 0 : i32
    return %arg0, %c0_i32 : i32, i32
  }
  func.func @transform_6(%arg0: i32) -> (i32, i32) {
    %c0_i32 = arith.constant 0 : i32
    %c0_i32_0 = arith.constant 0 : i32
    return %arg0, %c0_i32 : i32, i32
  }
  func.func @transform_7(%arg0: i32) -> (i32, i32) {
    %c0_i32 = arith.constant 0 : i32
    %c0_i32_0 = arith.constant 0 : i32
    %c0_i32_1 = arith.constant 0 : i32
    return %c0_i32, %c0_i32_0 : i32, i32
  }
  func.func @transform_8(%arg0: i32) -> (i32, i32) {
    %c0_i32 = arith.constant 0 : i32
    %c0_i32_0 = arith.constant 0 : i32
    %c0_i32_1 = arith.constant 0 : i32
    return %c0_i32, %c0_i32_0 : i32, i32
  }
  func.func @transform_9(%arg0: i32) -> (i32, i32) {
    %c0_i32 = arith.constant 0 : i32
    %c0_i32_0 = arith.constant 0 : i32
    %c0_i32_1 = arith.constant 0 : i32
    return %c0_i32, %c0_i32_0 : i32, i32
  }
  func.func @transform_10(%arg0: i32) -> (i32, i32) {
    %c0_i32 = arith.constant 0 : i32
    %c0_i32_0 = arith.constant 0 : i32
    %c0_i32_1 = arith.constant 0 : i32
    return %c0_i32, %c0_i32_0 : i32, i32
  }
  func.func @transform_11(%arg0: i32) -> (i32, i32) {
    %c0_i32 = arith.constant 0 : i32
    %c0_i32_0 = arith.constant 0 : i32
    %c0_i32_1 = arith.constant 0 : i32
    return %c0_i32, %c0_i32_0 : i32, i32
  }
  func.func @transform_12(%arg0: i32) -> (i32, i32) {
    %c0_i32 = arith.constant 0 : i32
    %c0_i32_0 = arith.constant 0 : i32
    %c0_i32_1 = arith.constant 0 : i32
    return %c0_i32, %c0_i32_0 : i32, i32
  }
  func.func @transform_13(%arg0: i32) -> (i32, i32) {
    %c0_i32 = arith.constant 0 : i32
    %c0_i32_0 = arith.constant 0 : i32
    %c0_i32_1 = arith.constant 0 : i32
    return %c0_i32, %c0_i32_0 : i32, i32
  }
  func.func @transform_14(%arg0: i32) -> (i32, i32) {
    %c0_i32 = arith.constant 0 : i32
    %c0_i32_0 = arith.constant 0 : i32
    %c0_i32_1 = arith.constant 0 : i32
    return %c0_i32, %c0_i32_0 : i32, i32
  }
  func.func @transform_15(%arg0: i32) -> (i32, i32) {
    %c0_i32 = arith.constant 0 : i32
    %c0_i32_0 = arith.constant 0 : i32
    %c0_i32_1 = arith.constant 0 : i32
    return %c0_i32, %c0_i32_0 : i32, i32
  }
  func.func @transform_16(%arg0: i32) -> (i32, i32) {
    %c0_i32 = arith.constant 0 : i32
    %c0_i32_0 = arith.constant 0 : i32
    %c0_i32_1 = arith.constant 0 : i32
    return %c0_i32, %c0_i32_0 : i32, i32
  }
  func.func @transform_17(%arg0: i32) -> (i32, i32) {
    %c0_i32 = arith.constant 0 : i32
    %c0_i32_0 = arith.constant 0 : i32
    %c0_i32_1 = arith.constant 0 : i32
    return %c0_i32, %c0_i32_0 : i32, i32
  }
  func.func @transform_18(%arg0: i32) -> (i32, i32) {
    %c0_i32 = arith.constant 0 : i32
    %c0_i32_0 = arith.constant 0 : i32
    %c0_i32_1 = arith.constant 0 : i32
    return %c0_i32, %c0_i32_0 : i32, i32
  }
  func.func @transform_19(%arg0: i32) -> (i32, i32) {
    %c0_i32 = arith.constant 0 : i32
    %c0_i32_0 = arith.constant 0 : i32
    return %arg0, %c0_i32 : i32, i32
  }
  func.func @transform_20(%arg0: i32) -> (i32, i32, i32) {
    %c0_i32 = arith.constant 0 : i32
    %c0_i32_0 = arith.constant 0 : i32
    %c0_i32_1 = arith.constant 0 : i32
    return %c0_i32, %arg0, %c0_i32_0 : i32, i32, i32
  }
  func.func @transform_21(%arg0: i32) -> (i32, i32) {
    %c0_i32 = arith.constant 0 : i32
    %c0_i32_0 = arith.constant 0 : i32
    return %arg0, %c0_i32 : i32, i32
  }
}

</mosaic_0001>

<bundles_post_ra>
// kernel: tpu_custom_call.1
= control target key start
LH: loop header
LB: loop body
LE: loop exit
PB: predicated region body
PF: predicated region fallthrough
CT: control target
= control target key end

     0   :  { %s1832_s0 = inlined_call_operand.hbm [shape: f32[2,32], index: 0, kind: input, shape index: {}]   ;;  %s1833_s1 = inlined_call_operand.hbm [shape: bf16[2,8,32], index: 1, kind: input, shape index: {}]   ;;  %s1834_s2 = inlined_call_operand.hbm [shape: bf16[2,8,32], index: 2, kind: input, shape index: {}]   ;;  %s1835_s3 = inlined_call_operand.vmem [shape: f32[2,8], index: 3, kind: input, shape index: {}]   ;;  %s1836_s4 = inlined_call_operand.vmem [shape: f32[2,32], index: 4, kind: input, shape index: {}]   ;;  %s1837_s5 = inlined_call_operand.vmem [shape: f32[2,32], index: 5, kind: input, shape index: {}]   ;;  %s1838_s6 = inlined_call_operand.vmem [shape: f32[2,32], index: 6, kind: input, shape index: {}]   ;;  %s1839_s7 = inlined_call_operand.hbm [shape: f32[32,32], index: 7, kind: input, shape index: {}]   ;;  %s1840_s8 = inlined_call_operand.vmem [shape: f32[1,32], index: 8, kind: input, shape index: {}]   ;;  %s1841_s9 = inlined_call_operand.vmem [shape: f32[1,32], index: 9, kind: input, shape index: {}]   ;;  %s1842_s10 = inlined_call_operand.hbm [shape: f32[32,32], index: 10, kind: input, shape index: {}]   ;;  %s1843_s11 = inlined_call_operand.hbm [shape: f32[32,32], index: 11, kind: input, shape index: {}]   ;;  %s1844_s12 = inlined_call_operand.hbm [shape: f32[32,32], index: 12, kind: input, shape index: {}]   ;;  %s1845_s13 = inlined_call_operand.hbm [shape: f32[32,32], index: 13, kind: input, shape index: {}]   ;;  %s1846_s14 = inlined_call_operand.hbm [shape: f32[32,32], index: 14, kind: input, shape index: {}]   ;;  %s1847_s15 = inlined_call_operand.hbm [shape: f32[32,32], index: 15, kind: input, shape index: {}]   ;;  %s1848_s16 = inlined_call_operand.vmem [shape: f32[1,32], index: 16, kind: input, shape index: {}]   ;;  %s1849_s17 = inlined_call_operand.hbm [shape: f32[32,32], index: 17, kind: input, shape index: {}]   ;;  %s1850_s18 = inlined_call_operand.vmem [shape: f32[1,32], index: 18, kind: input, shape index: {}]   ;;  %s1851_s19 = inlined_call_operand.hbm [shape: f32[2,32], index: 19, kind: output, shape index: {0}]   ;;  %s1852_s20 = inlined_call_operand.hbm [shape: f32[1,2,32], index: 20, kind: output, shape index: {1}]   ;;  %s1853_s21 = inlined_call_operand.hbm [shape: f32[2,8], index: 21, kind: output, shape index: {2}]  }
   0x1   :  { %1854 = sst [smem:[#allocation32_spill]] %s1832_s0 }
   0x2   :  { %1855 = sst [smem:[#allocation33_spill]] %s1833_s1 }
   0x3   :  { %1856 = sst [smem:[#allocation34_spill]] %s1834_s2 }
   0x4   :  { %1857 = sst [smem:[#allocation35_spill]] %s1835_s3 }
   0x5   :  { %1858 = sst [smem:[#allocation36_spill]] %s1836_s4 }
   0x6   :  { %1859 = sst [smem:[#allocation37_spill]] %s1837_s5 }
   0x7   :  { %27 = vsyncpa [#allocation3], 0 }
   0x8   :  { %28 = vsyncpa [#allocation6], 0 }
   0x9   :  { %29 = vsyncpa [#allocation9], 0 }
   0xa   :  { %30 = vsyncpa [#allocation12], 0 }
   0xb   :  { %31 = vsyncpa [#allocation15], 0 }
   0xc   :  { %32 = vsyncpa [#allocation18], 0 }
   0xd   :  { %33 = vsyncpa [#allocation4], 0 }
   0xe   :  { %34 = vsyncpa [#allocation22], 0  ;;  %s1520_s2 = smov [#allocation5]  }
   0xf   :  { %s50_s25 = sshll.u32 %s1520_s2, 4  ;;  %s51_s25 = int_to_ptr.vmem [resolvable:$true] %s50_s25 }
  0x10   :  { %s1232_s26 = scalar_lea.vmem %s51_s25, 128  ;;  %p1237_p1 = scmp.lt.s32.totalorder %s51_s25, %s51_s25 }
  0x11   :  { %p1233_p0 = scmp.ne.s32.totalorder %s51_s25, %s1232_s26  ;;  %p1238_p2 = scmp.lt.s32.totalorder %s1232_s26, %s1232_s26 }
  0x13   :  { %p1239_p3 = por %p1238_p2, %p1237_p1 }
  0x15   :  { %p1240_p4 = pnand %p1239_p3, %p1233_p0 }
  0x17   :  { %1243 = shalt.err (!%p1240_p4)
}
  0x18   :  { %s1521_s27 = smov 64   ;;  %s1522_s3 = smov 4  }
  0x19   :  { %s1860_s0 = sld [smem:[#allocation33_spill]]  ;;  %s1523_s4 = smov [#allocation8]  }
  0x1a   :  { %s82_s30 = sshll.u32 %s1523_s4, 4  ;;  %s83_s30 = int_to_ptr.vmem [resolvable:$true] %s82_s30 }
  0x1b   :  { %s1252_s5 = scalar_lea.vmem %s83_s30, 512  ;;  %p1257_p6 = scmp.lt.s32.totalorder %s83_s30, %s83_s30 }
  0x1c   :  { %p1253_p5 = scmp.ne.s32.totalorder %s83_s30, %s1252_s5  ;;  %p1258_p7 = scmp.lt.s32.totalorder %s1252_s5, %s1252_s5 }
  0x1e   :  { %p1259_p8 = por %p1258_p7, %p1257_p6 }
  0x1f   :  { %56 = dma.hbm_to_vmem [thread:$0]  %s1860_s0, 128, %s51_s25, [#allocation6], %s1521_s27, %s1521_s27, %s1522_s3  }
  0x20   :  { %p1260_p9 = pnand %p1259_p8, %p1253_p5 }
  0x22   :  { %1263 = shalt.err (!%p1260_p9)
}
  0x23   :  { %s1524_s22 = smov 128   ;;  %s1525_s23 = smov 8  }
  0x24   :  { %88 = dma.hbm_to_vmem [thread:$0]  %s1839_s7, 512, %s83_s30, [#allocation9], %s1524_s22, %s1524_s22, %s1525_s23  }
  0x25   :  { %s1526_s2 = smov [#allocation11]   ;;  %s1527_s26 = smov [#allocation14]  }
  0x26   :  { %s110_s25 = sshll.u32 %s1526_s2, 4  ;;  %s134_s28 = sshll.u32 %s1527_s26, 4  ;;  %s111_s25 = int_to_ptr.vmem [resolvable:$true] %s110_s25  ;;  %s135_s28 = int_to_ptr.vmem [resolvable:$true] %s134_s28 }
  0x27   :  { %s1272_s29 = scalar_lea.vmem %s111_s25, 512  ;;  %p1277_p11 = scmp.lt.s32.totalorder %s111_s25, %s111_s25 }
  0x28   :  { %p1273_p10 = scmp.ne.s32.totalorder %s111_s25, %s1272_s29  ;;  %p1278_p12 = scmp.lt.s32.totalorder %s1272_s29, %s1272_s29 }
  0x2a   :  { %p1279_p13 = por %p1278_p12, %p1277_p11 }
  0x2c   :  { %p1280_p0 = pnand %p1279_p13, %p1273_p10 }
  0x2e   :  { %1283 = shalt.err (!%p1280_p0)
}
  0x2f   :  { %116 = dma.hbm_to_vmem [thread:$0]  %s1843_s11, 512, %s111_s25, [#allocation12], %s1524_s22, %s1524_s22, %s1525_s23  }
  0x30   :  { %s1292_s7 = scalar_lea.vmem %s135_s28, 512  ;;  %p1297_p2 = scmp.lt.s32.totalorder %s135_s28, %s135_s28 }
  0x31   :  { %p1293_p1 = scmp.ne.s32.totalorder %s135_s28, %s1292_s7  ;;  %p1298_p3 = scmp.lt.s32.totalorder %s1292_s7, %s1292_s7 }
  0x33   :  { %p1299_p4 = por %p1298_p3, %p1297_p2 }
  0x35   :  { %p1300_p5 = pnand %p1299_p4, %p1293_p1 }
  0x37   :  { %1303 = shalt.err (!%p1300_p5)
}
  0x38   :  { %140 = dma.hbm_to_vmem [thread:$0]  %s1845_s13, 512, %s135_s28, [#allocation15], %s1524_s22, %s1524_s22, %s1525_s23  }
  0x39   :  { %s1528_s1 = smov [#allocation17]   ;;  %s1529_s2 = smov [#allocation2]  }
  0x3a   :  { %s158_s24 = sshll.u32 %s1528_s1, 4  ;;  %s41_s26 = sshll.u32 %s1529_s2, 4  ;;  %s159_s24 = int_to_ptr.vmem [resolvable:$true] %s158_s24  ;;  %s42_s26 = int_to_ptr.vmem [resolvable:$true] %s41_s26 }
  0x3b   :  { %s1312_s11 = scalar_lea.vmem %s159_s24, 512  ;;  %p1317_p7 = scmp.lt.s32.totalorder %s159_s24, %s159_s24 }
  0x3c   :  { %p1313_p6 = scmp.ne.s32.totalorder %s159_s24, %s1312_s11  ;;  %p1318_p8 = scmp.lt.s32.totalorder %s1312_s11, %s1312_s11 }
  0x3e   :  { %p1319_p9 = por %p1318_p8, %p1317_p7 }
  0x40   :  { %p1320_p10 = pnand %p1319_p9, %p1313_p6 }
  0x42   :  { %1323 = shalt.err (!%p1320_p10)
}
  0x43   :  { %164 = dma.hbm_to_vmem [thread:$0]  %s1847_s15, 512, %s159_s24, [#allocation18], %s1524_s22, %s1524_s22, %s1525_s23  }
  0x44   :  { %s1332_s13 = scalar_lea.vmem %s42_s26, 32  ;;  %p1337_p12 = scmp.lt.s32.totalorder %s42_s26, %s42_s26 }
  0x45   :  { %p1333_p11 = scmp.ne.s32.totalorder %s42_s26, %s1332_s13  ;;  %p1338_p13 = scmp.lt.s32.totalorder %s1332_s13, %s1332_s13 }
  0x47   :  { %p1339_p0 = por %p1338_p13, %p1337_p12 }
  0x49   :  { %p1340_p1 = pnand %p1339_p0, %p1333_p11 }
  0x4b   :  { %1343 = shalt.err (!%p1340_p1)
}
  0x4c   :  { %s1861_s4 = sld [smem:[#allocation32_spill]]  ;;  %s1530_s7 = smov [#allocation7]  }
  0x4d   :  { %s62_s30 = sshll.u32 %s1530_s7, 4  ;;  %s1531_s5 = smov [#allocation10]   ;;  %s63_s30 = int_to_ptr.vmem [resolvable:$true] %s62_s30 }
  0x4e   :  { %s98_s1 = sshll.u32 %s1531_s5, 4  ;;  %s1352_s2 = scalar_lea.vmem %s63_s30, 128  ;;  %s99_s1 = int_to_ptr.vmem [resolvable:$true] %s98_s1 }
  0x4f   :  { %p1353_p2 = scmp.ne.s32.totalorder %s63_s30, %s1352_s2  ;;  %p1357_p3 = scmp.lt.s32.totalorder %s63_s30, %s63_s30 }
  0x50   :  { %p1358_p4 = scmp.lt.s32.totalorder %s1352_s2, %s1352_s2 }
  0x52   :  { %44 = dma.hbm_to_vmem [thread:$0]  %s1861_s4, 32, %s42_s26, [#allocation3]  }
  0x53   :  { %p1359_p5 = por %p1358_p4, %p1357_p3 }
  0x55   :  { %p1360_p6 = pnand %p1359_p5, %p1353_p2 }
  0x57   :  { %1363 = shalt.err (!%p1360_p6)
}
  0x58   :  { %s1862_s11 = sld [smem:[#allocation34_spill]]  ;;  %s1372_s26 = scalar_lea.vmem %s99_s1, 512 }
  0x59   :  { %p1373_p7 = scmp.ne.s32.totalorder %s99_s1, %s1372_s26  ;;  %p1377_p8 = scmp.lt.s32.totalorder %s99_s1, %s99_s1 }
  0x5a   :  { %p1378_p9 = scmp.lt.s32.totalorder %s1372_s26, %s1372_s26 }
  0x5c   :  { %p1379_p10 = por %p1378_p9, %p1377_p8 }
  0x5e   :  { %68 = dma.hbm_to_vmem [thread:$0]  %s1862_s11, 128, %s63_s30, [#allocation6], %s1521_s27, %s1521_s27, %s1522_s3  }
  0x5f   :  { %p1380_p11 = pnand %p1379_p10, %p1373_p7 }
  0x61   :  { %1383 = shalt.err (!%p1380_p11)
}
  0x62   :  { %104 = dma.hbm_to_vmem [thread:$0]  %s1842_s10, 512, %s99_s1, [#allocation9], %s1524_s22, %s1524_s22, %s1525_s23  }
  0x63   :  { %s1532_s13 = smov [#allocation13]   ;;  %s1533_s0 = smov [#allocation16]  }
  0x64   :  { %s122_s28 = sshll.u32 %s1532_s13, 4  ;;  %s146_s4 = sshll.u32 %s1533_s0, 4  ;;  %s123_s28 = int_to_ptr.vmem [resolvable:$true] %s122_s28  ;;  %s147_s4 = int_to_ptr.vmem [resolvable:$true] %s146_s4 }
  0x65   :  { %s1392_s27 = scalar_lea.vmem %s123_s28, 512  ;;  %p1397_p13 = scmp.lt.s32.totalorder %s123_s28, %s123_s28 }
  0x66   :  { %p1393_p12 = scmp.ne.s32.totalorder %s123_s28, %s1392_s27  ;;  %p1398_p0 = scmp.lt.s32.totalorder %s1392_s27, %s1392_s27 }
  0x68   :  { %p1399_p1 = por %p1398_p0, %p1397_p13 }
  0x6a   :  { %p1400_p2 = pnand %p1399_p1, %p1393_p12 }
  0x6c   :  { %1403 = shalt.err (!%p1400_p2)
}
  0x6d   :  { %128 = dma.hbm_to_vmem [thread:$0]  %s1844_s12, 512, %s123_s28, [#allocation12], %s1524_s22, %s1524_s22, %s1525_s23  }
  0x6e   :  { %s1412_s10 = scalar_lea.vmem %s147_s4, 512  ;;  %p1417_p4 = scmp.lt.s32.totalorder %s147_s4, %s147_s4 }
  0x6f   :  { %p1413_p3 = scmp.ne.s32.totalorder %s147_s4, %s1412_s10  ;;  %p1418_p5 = scmp.lt.s32.totalorder %s1412_s10, %s1412_s10 }
  0x71   :  { %p1419_p6 = por %p1418_p5, %p1417_p4 }
  0x73   :  { %p1420_p7 = pnand %p1419_p6, %p1413_p3 }
  0x75   :  { %1423 = shalt.err (!%p1420_p7)
}
  0x76   :  { %152 = dma.hbm_to_vmem [thread:$0]  %s1846_s14, 512, %s147_s4, [#allocation15], %s1524_s22, %s1524_s22, %s1525_s23  }
  0x77   :  { %s1534_s1 = smov [#allocation19]  }
  0x78   :  { %s172_s2 = sshll.u32 %s1534_s1, 4  ;;  %s173_s2 = int_to_ptr.vmem [resolvable:$true] %s172_s2 }
  0x79   :  { %s1432_s15 = scalar_lea.vmem %s173_s2, 512  ;;  %p1437_p9 = scmp.lt.s32.totalorder %s173_s2, %s173_s2 }
  0x7a   :  { %p1433_p8 = scmp.ne.s32.totalorder %s173_s2, %s1432_s15  ;;  %p1438_p10 = scmp.lt.s32.totalorder %s1432_s15, %s1432_s15 }
  0x7c   :  { %p1439_p11 = por %p1438_p10, %p1437_p9 }
  0x7e   :  { %p1440_p12 = pnand %p1439_p11, %p1433_p8 }
  0x80   :  { %1443 = shalt.err (!%p1440_p12)
}
  0x81   :  { %178 = dma.hbm_to_vmem [thread:$0]  %s1849_s17, 512, %s173_s2, [#allocation18], %s1524_s22, %s1524_s22, %s1525_s23  }
  0x82   :  { %1504 = dma.done.wait [#allocation3], 32  }
  0x83   :  { %1505 = vsyncadd [#allocation3], 4294967264 }
  0x84   :  { %1506 = dma.done.wait [#allocation6], 256  }
  0x85   :  { %1507 = vsyncadd [#allocation6], 4294967040 }
  0x86   :  { %1508 = dma.done.wait [#allocation9], 1024  }
  0x87   :  { %1509 = vsyncadd [#allocation9], 4294966272 }
  0x88   :  { %1510 = dma.done.wait [#allocation12], 1024  }
  0x89   :  { %1511 = vsyncadd [#allocation12], 4294966272 }
  0x8a   :  { %1512 = dma.done.wait [#allocation15], 1024  }
  0x8b   :  { %1513 = vsyncadd [#allocation15], 4294966272 }
  0x8c   :  { %1514 = dma.done.wait [#allocation18], 1024  }
  0x8d   :  { %1515 = vsyncadd [#allocation18], 4294966272  ;;  %v1535_v0 = vmov 0.0   ;;  %vm1536_vm0 = vmmov 0   ;;  %v219_v1 = vld [vmem:[#allocation8 + $0x18] sm:$0xff]  ;;  %v218_v2 = vld [vmem:[#allocation8 + $0x10] sm:$0xff]  ;;  %v310_v8 = vlaneseq }
  0x8e   :  { %1097 = vmatprep.subr.mxu0 %v1535_v0  ;;  %1105 = vmatprep.mubr.msk.f32.mxu0 %vm1536_vm0, %v1535_v0  ;;  %v217_v3 = vld [vmem:[#allocation8 + $0x8] sm:$0xff]  ;;  %v216_v4 = vld [vmem:[#allocation8] sm:$0xff]  ;;  %vm227_vm1 = vcmask 261120   ;;  %v1537_v6 = vmov 1966171168   ;;  %v1050_v15 = vld [vmem:[#allocation5] sm:$0xff]  }
  0x8f   :  { %1108 = vmatprep.subr.mxu1 %v1535_v0  ;;  %1116 = vmatprep.mubr.msk.f32.mxu1 %vm1536_vm0, %v1535_v0  ;;  %v1722_v5 = vld [vmem:[#allocation2] sm:$0x3]  ;;  %v308_v7 = vunpack.c.l.s4 %v1537_v6  ;;  %v1730_v10 = vshrl.u32 %v310_v8, 7  ;;  %v1051_v19 = vunpack.c.l.bf16 %v1050_v15  ;;  %v1052_v22 = vunpack.c.h.bf16 %v1050_v15  ;;  %s1863_s26 = sld [smem:[#allocation35_spill]]  ;;  %v423_v52 = vld [vmem:[#allocation10 + $0x18] sm:$0xff]  ;;  %v422_v56 = vld [vmem:[#allocation10 + $0x10] sm:$0xff] }
  0x90   :  { %1098 = vmatpush3.msra.mxu0 %v219_v1  ;;  %v1035_v11 = vld [vmem:[%s1840_s8] ss:$0 sm:$0xff]  ;;  %v361_v35 = vand.u32 127, %v310_v8  ;;  %vm370_vm2 = vcmask 1041409   ;;  %vm374_vm4 = vcmask 58368   ;;  %v503_v53 = vld [vmem:[#allocation11 + $0x18] sm:$0xff]  ;;  %1109 = vmatpush3.msra.mxu1 %v423_v52 }
  0x91   :  { %1099 = vmatprep.subr.mxu0 %v1535_v0  ;;  %v309_v9 = vunpack.c.0.s8 %v308_v7  ;;  %v1737_v18 = vsub.s32 0, %v1730_v10  ;;  %v1037_v28 = vld [vmem:[%s1841_s9] ss:$0 sm:$0xff]  ;;  %v399_v51 = vsub.s32 1, %v1730_v10  ;;  %1110 = vmatprep.subr.mxu1 %v1535_v0  ;;  %v502_v57 = vld [vmem:[#allocation11 + $0x10] sm:$0xff]  ;;  %v420_v62 = vld [vmem:[#allocation10] sm:$0xff] }
  0x92   :  { %1100 = vmatpush3.msra.mxu0 %v218_v2  ;;  %v364_v37 = vsub.s32 %v361_v35, %v1730_v10  ;;  %1111 = vmatpush3.msra.mxu1 %v422_v56  ;;  %v421_v60 = vld [vmem:[#allocation10 + $0x8] sm:$0xff]  ;;  %v500_v63 = vld [vmem:[#allocation11] sm:$0xff]  ;;  %v1054_v1 = vld [vmem:[#allocation7] sm:$0xff]   ;;  %s1864_s29 = sld [smem:[#allocation36_spill]]  ;;  %vm984_vm5 = vcmask 254976  }
  0x93   :  { %1101 = vmatprep.subr.mxu0 %v1535_v0  ;;  %v312_v12 = vsub.s32 %v309_v9, %v1730_v10  ;;  %1112 = vmatprep.subr.mxu1 %v1535_v0  ;;  %v501_v61 = vld [vmem:[#allocation11 + $0x8] sm:$0xff]  ;;  %v1056_v2 = vunpack.c.h.bf16 %v1054_v1  ;;  %v800_v35 = vld [vmem:[#allocation17 + $0x10] sm:$0xff]  ;;  %s1865_s0 = sld [smem:[#allocation37_spill]] }
  0x94   :  { %1102 = vmatpush3.msra.mxu0 %v217_v3  ;;  %1113 = vmatpush3.msra.mxu1 %v421_v60  ;;  %v1055_v3 = vunpack.c.l.bf16 %v1054_v1 }
  0x95   :  { %1103 = vmatprep.subr.mxu0 %v1535_v0  ;;  %v215_v38 = vld [vmem:[%s1863_s26] sm:$0x3]  ;;  %1114 = vmatprep.subr.mxu1 %v1535_v0 }
  0x96   :  { %1104 = vmatpush3.msra.mxu0 %v216_v4  ;;  %vm357_vm3 = vcmp.eq.f32.partialorder %v215_v38, 0.0  ;;  %1115 = vmatpush3.msra.mxu1 %v420_v62  ;;  %v724_v38 = vld [vmem:[#allocation16] sm:$0xff] }
  0x97   :  { %1106 = vmatmul.mubr.msk.f32.vlgmr.msra.gmra.mxu0 %vm227_vm1, %v1722_v5  ;;  %1119 = vmatprep.subr.mxu0 %v1535_v0 }
  0x98   :  { %1127 = vmatprep.mubr.msk.f32.mxu0 %vm1536_vm0, %v1535_v0  ;;  %1120 = vmatpush3.msra.mxu0 %v503_v53 }
  0x99   :  { %1121 = vmatprep.subr.mxu0 %v1535_v0  ;;  %1130 = vmatprep.subr.mxu1 %v1535_v0 }
  0x9a   :  { %1122 = vmatpush3.msra.mxu0 %v502_v57 }
  0x9b   :  { %1123 = vmatprep.subr.mxu0 %v1535_v0 }
  0x9c   :  { %1124 = vmatpush3.msra.mxu0 %v501_v61 }
  0x9d   :  { %1125 = vmatprep.subr.mxu0 %v1535_v0 }
  0x9e   :  { %1126 = vmatpush3.msra.mxu0 %v500_v63 }
  0x9f   :  { %1141 = vmatprep.subr.mxu0 %v1535_v0 }
 0x157   :  { %v297_v13 = vpop.f32.mrf.mxu0 }
 0x158   :  { %v298_v14 = vadd.f32 %v1035_v11, %v297_v13 }
 0x159   :  { %v1107_v16 = vpop.f32.mrf.mxu0 }
 0x15a   :  { %v313_v17 = vrot.slane %v298_v14, %v312_v12 }
 0x15c   :  { %v314_v20 = vcombine.high %v313_v17, %v313_v17  ;;  %v321_v21 = vrot.slane %v313_v17, %v312_v12 }
 0x15e   :  { %v328_v23 = vrot.slane %v314_v20, %v312_v12  ;;  %v332_v24 = vrot.slane %v321_v21, %v1737_v18 }
 0x160   :  { %v336_v25 = vrot.slane %v328_v23, %v1737_v18  ;;  %v339_v26 = vadd.f32 %v1051_v19, %v332_v24  ;;  %v578_v23 = vld [vmem:[#allocation13 + $0x18] sm:$0xff] }
 0x161   :  { %v653_v24 = vld [vmem:[#allocation14 + $0x18] sm:$0xff] }
 0x162   :  { %v340_v27 = vadd.f32 %v1052_v22, %v336_v25  ;;  %1206 = vtanh.f32 %v339_v26  ;;  %v577_v26 = vld [vmem:[#allocation13 + $0x10] sm:$0xff] }
 0x164   :  { %1208 = vtanh.f32 %v340_v27  ;;  %v652_v27 = vld [vmem:[#allocation14 + $0x10] sm:$0xff] }
 0x16f   :  { %v1207_v29 = vpop.eup %1206 }
 0x170   :  { %v349_v30 = vmul.f32 %v1207_v29, %v1037_v28  ;;  %v651_v29 = vld [vmem:[#allocation14 + $0x8] sm:$0xff] }
 0x171   :  { %v1209_v31 = vpop.eup %1208 }
 0x172   :  { %v351_v32 = vsel %vm227_vm1, %v349_v30, 0.0  ;;  %v350_v33 = vmul.f32 %v1209_v31, %v1037_v28  ;;  %v576_v28 = vld [vmem:[#allocation13 + $0x8] sm:$0xff]  ;;  %v575_v30 = vld [vmem:[#allocation13] sm:$0xff] }
 0x173   :  { %352 = vadd.xlane.f32.xlu0 %v351_v32  ;;  %v650_v31 = vld [vmem:[#allocation14] sm:$0xff]  ;;  %v727_v32 = vld [vmem:[#allocation16 + $0x18] sm:$0xff] }
 0x174   :  { %v354_v34 = vsel %vm227_vm1, %v350_v33, 0.0  ;;  %v801_v33 = vld [vmem:[#allocation17 + $0x18] sm:$0xff] }
 0x177   :  { %355 = vadd.xlane.f32.xlu0 %v354_v34  ;;  %v726_v34 = vld [vmem:[#allocation16 + $0x10] sm:$0xff] }
 0x1fc   :  { %v353_v36 = vpop.xlane.xlu0 %352 }
 0x1fd   :  { %v365_v40 = vrot.slane %v353_v36, %v364_v37  ;;  %v725_v36 = vld [vmem:[#allocation16 + $0x8] sm:$0xff] }
 0x200   :  { %v356_v39 = vpop.xlane.xlu0 %355 }
 0x201   :  { %v369_v41 = vrot.slane %v356_v39, %v364_v37  ;;  %v799_v37 = vld [vmem:[#allocation17 + $0x8] sm:$0xff]  ;;  %v798_v39 = vld [vmem:[#allocation17] sm:$0xff] }
 0x203   :  { %v371_v42 = vsel %vm370_vm2, %v369_v41, %v365_v40  ;;  %v903_v40 = vld [vmem:[#allocation19 + $0x18] sm:$0xff]  ;;  %v902_v41 = vld [vmem:[#allocation19 + $0x10] sm:$0xff] }
 0x204   :  { %v373_v43 = vsel %vm357_vm3, -3.4028235e+38, %v371_v42  ;;  %v901_v42 = vld [vmem:[#allocation19 + $0x8] sm:$0xff] }
 0x205   :  { %v375_v44 = vsel %vm374_vm4, %v373_v43, -inf }
 0x206   :  { %376 = vmax.xlane.f32.xlu1 %v375_v44 }
 0x28f   :  { %v377_v45 = vpop.xlane.xlu1 %376 }
 0x290   :  { %v378_v46 = vsub.f32 %v373_v43, %v377_v45  ;;  %v900_v43 = vld [vmem:[#allocation19] sm:$0xff] }
 0x292   :  { %v379_v47 = vmul.f32 1.442695, %v378_v46 }
 0x294   :  { %1210 = vpow2.f32 %v379_v47 }
 0x2a1   :  { %v1211_v48 = vpop.eup %1210 }
 0x2a2   :  { %v381_v49 = vsel %vm374_vm4, %v1211_v48, 0.0 }
 0x2a3   :  { %382 = vadd.xlane.f32.xlu1 %v381_v49 }
 0x32c   :  { %v383_v50 = vpop.xlane.xlu1 %382 }
 0x32d   :  { %1212 = vrcp.f32 %v383_v50 }
 0x33a   :  { %v1213_v54 = vpop.eup %1212 }
 0x33b   :  { %v385_v55 = vmul.f32 %v1213_v54, %v1211_v48  ;;  %v424_v48 = vld [vmem:[%s1864_s29] sm:$0x3] }
 0x33d   :  { %v400_v58 = vrot.slane %v385_v55, %v399_v51  ;;  %987 = vst.msk [vmem:[#allocation23] sm:$0x3] %vm374_vm4, %v385_v55  ;;  %v393_v59 = vrot.slane %v385_v55, %v1737_v18 }
 0x33f   :  { %402 = vbcast.lane.b32.xlu1 %v400_v58, 256  ;;  %395 = vbcast.lane.b32.xlu0 %v393_v59, 256 }
 0x3b1   :  { %v403_v4 = vpop.permute.xlu1 %402  ;;  %v396_v6 = vpop.permute.xlu0 %395 }
 0x3b2   :  { %v405_v7 = vmul.f32 %v1056_v2, %v403_v4  ;;  %v404_v8 = vmul.f32 %v1055_v3, %v396_v6  ;;  %v1043_v3 = vld [vmem:[%s1848_s16] ss:$0 sm:$0xff]  ;;  %s1538_s16 = smov [#allocation21]  }
 0x3b4   :  { %v413_v9 = vsel %vm227_vm1, %v405_v7, 0.0  ;;  %v406_v10 = vsel %vm227_vm1, %v404_v8, 0.0  ;;  %v579_v7 = vld [vmem:[%s1838_s6] sm:$0x3]  ;;  %s1004_s6 = sshll.u32 %s1538_s16, 4  ;;  %s1005_s6 = int_to_ptr.vmem [resolvable:$true] %s1004_s6 }
 0x3b5   :  { %v414_v11 = vrot.slane %v413_v9, 4  ;;  %v407_v12 = vrot.slane %v406_v10, 4  ;;  %s1444_s10 = scalar_lea.vmem %s1005_s6, 32  ;;  %p1449_p0 = scmp.lt.s32.totalorder %s1005_s6, %s1005_s6 }
 0x3b6   :  { %p1445_p13 = scmp.ne.s32.totalorder %s1005_s6, %s1444_s10  ;;  %p1450_p1 = scmp.lt.s32.totalorder %s1444_s10, %s1444_s10 }
 0x3b7   :  { %v415_v13 = vadd.f32 %v414_v11, %v413_v9  ;;  %v408_v14 = vadd.f32 %v407_v12, %v406_v10 }
 0x3b8   :  { %p1451_p2 = por %p1450_p1, %p1449_p0 }
 0x3b9   :  { %v416_v15 = vrot.slane %v415_v13, 2  ;;  %v409_v16 = vrot.slane %v408_v14, 2 }
 0x3ba   :  { %p1452_p3 = pnand %p1451_p2, %p1445_p13 }
 0x3bb   :  { %v417_v17 = vadd.f32 %v416_v15, %v415_v13  ;;  %v410_v18 = vadd.f32 %v409_v16, %v408_v14 }
 0x3bd   :  { %v418_v19 = vrot.slane %v417_v17, 1  ;;  %v411_v20 = vrot.slane %v410_v18, 1 }
 0x3bf   :  { %v419_v21 = vadd.f32 %v418_v19, %v417_v17  ;;  %v412_v22 = vadd.f32 %v411_v20, %v410_v18 }
 0x3c1   :  { %v427_v25 = vsel %vm370_vm2, %v419_v21, %v412_v22 }
 0x3c2   :  { %1117 = vmatmul.mubr.msk.f32.vlgmr.msra.gmra.mxu1 %vm227_vm1, %v427_v25  ;;  %1128 = vmatmul.mubr.msk.f32.vlgmr.msra.gmra.mxu0 %vm227_vm1, %v427_v25 }
 0x3c3   :  { %1131 = vmatpush3.msra.mxu1 %v578_v23  ;;  %1142 = vmatpush3.msra.mxu0 %v653_v24 }
 0x3c4   :  { %1132 = vmatprep.subr.mxu1 %v1535_v0  ;;  %1143 = vmatprep.subr.mxu0 %v1535_v0 }
 0x3c5   :  { %1133 = vmatpush3.msra.mxu1 %v577_v26  ;;  %1144 = vmatpush3.msra.mxu0 %v652_v27 }
 0x3c6   :  { %1134 = vmatprep.subr.mxu1 %v1535_v0  ;;  %1145 = vmatprep.subr.mxu0 %v1535_v0 }
 0x3c7   :  { %1135 = vmatpush3.msra.mxu1 %v576_v28  ;;  %1146 = vmatpush3.msra.mxu0 %v651_v29 }
 0x3c8   :  { %1136 = vmatprep.subr.mxu1 %v1535_v0  ;;  %1147 = vmatprep.subr.mxu0 %v1535_v0 }
 0x3c9   :  { %1137 = vmatpush3.msra.mxu1 %v575_v30  ;;  %1138 = vmatprep.mubr.msk.f32.mxu1 %vm1536_vm0, %v1535_v0 }
 0x3ca   :  { %1148 = vmatpush3.msra.mxu0 %v650_v31  ;;  %1149 = vmatprep.mubr.msk.f32.mxu0 %vm1536_vm0, %v1535_v0 }
 0x3cb   :  { %1139 = vmatmul.mubr.msk.f32.vlgmr.msra.gmra.mxu1 %vm227_vm1, %v427_v25  ;;  %1150 = vmatmul.mubr.msk.f32.vlgmr.msra.gmra.mxu0 %vm227_vm1, %v1722_v5 }
 0x3cc   :  { %1152 = vmatprep.subr.mxu1 %v1535_v0  ;;  %1160 = vmatprep.mubr.msk.f32.mxu1 %vm1536_vm0, %v1535_v0 }
 0x3cd   :  { %1153 = vmatpush3.msra.mxu1 %v727_v32  ;;  %1163 = vmatprep.subr.mxu0 %v1535_v0 }
 0x3ce   :  { %1154 = vmatprep.subr.mxu1 %v1535_v0  ;;  %1164 = vmatpush3.msra.mxu0 %v801_v33 }
 0x3cf   :  { %1155 = vmatpush3.msra.mxu1 %v726_v34  ;;  %1165 = vmatprep.subr.mxu0 %v1535_v0 }
 0x3d0   :  { %1156 = vmatprep.subr.mxu1 %v1535_v0  ;;  %1166 = vmatpush3.msra.mxu0 %v800_v35 }
 0x3d1   :  { %1157 = vmatpush3.msra.mxu1 %v725_v36  ;;  %1167 = vmatprep.subr.mxu0 %v1535_v0 }
 0x3d2   :  { %1158 = vmatprep.subr.mxu1 %v1535_v0  ;;  %1168 = vmatpush3.msra.mxu0 %v799_v37 }
 0x3d3   :  { %1159 = vmatpush3.msra.mxu1 %v724_v38  ;;  %1169 = vmatprep.subr.mxu0 %v1535_v0 }
 0x3d4   :  { %1161 = vmatmul.mubr.msk.f32.vlgmr.msra.gmra.mxu1 %vm227_vm1, %v1722_v5  ;;  %1170 = vmatpush3.msra.mxu0 %v798_v39 }
 0x3d5   :  { %1171 = vmatprep.mubr.msk.f32.mxu0 %vm1536_vm0, %v1535_v0  ;;  %1174 = vmatprep.subr.mxu1 %v1535_v0 }
 0x3d6   :  { %1172 = vmatmul.mubr.msk.f32.vlgmr.msra.gmra.mxu0 %vm227_vm1, %v1722_v5  ;;  %1182 = vmatprep.mubr.msk.f32.mxu1 %vm1536_vm0, %v1535_v0 }
 0x3d7   :  { %1175 = vmatpush3.msra.mxu1 %v903_v40 }
 0x3d8   :  { %1176 = vmatprep.subr.mxu1 %v1535_v0 }
 0x3d9   :  { %1177 = vmatpush3.msra.mxu1 %v902_v41 }
 0x3da   :  { %1178 = vmatprep.subr.mxu1 %v1535_v0 }
 0x3db   :  { %1179 = vmatpush3.msra.mxu1 %v901_v42 }
 0x3dc   :  { %1180 = vmatprep.subr.mxu1 %v1535_v0  ;;  %v504_v0 = vld [vmem:[%s1865_s0] sm:$0x3] }
 0x3dd   :  { %1181 = vmatpush3.msra.mxu1 %v900_v43 }
 0x482   :  { %v496_v44 = vpop.f32.mrf.mxu1  ;;  %v571_v45 = vpop.f32.mrf.mxu0 }
 0x483   :  { %v497_v49 = vadd.f32 %v496_v44, %v424_v48  ;;  %v572_v56 = vadd.f32 %v571_v45, %v504_v0 }
 0x484   :  { %v1118_v46 = vpop.f32.mrf.mxu1  ;;  %v1129_v47 = vpop.f32.mrf.mxu0 }
 0x48b   :  { %v646_v50 = vpop.f32.mrf.mxu1  ;;  %v720_v51 = vpop.f32.mrf.mxu0 }
 0x48c   :  { %v879_v52 = vadd.f32 %v720_v51, %v497_v49  ;;  %v647_v9 = vadd.f32 %v646_v50, %v579_v7 }
 0x48d   :  { %v1140_v53 = vpop.f32.mrf.mxu1  ;;  %v1151_v54 = vpop.f32.mrf.mxu0 }
 0x48e   :  { %v1045_v55 = vmul.f32 -1.442695, %v879_v52 }
 0x490   :  { %1214 = vpow2.f32 %v1045_v55 }
 0x494   :  { %v794_v57 = vpop.f32.mrf.mxu1 }
 0x495   :  { %v886_v58 = vadd.f32 %v794_v57, %v572_v56 }
 0x496   :  { %v1162_v59 = vpop.f32.mrf.mxu1  ;;  %v875_v60 = vpop.f32.mrf.mxu0 }
 0x497   :  { %v1046_v61 = vmul.f32 -1.442695, %v886_v58  ;;  %v876_v6 = vadd.f32 %v1043_v3, %v875_v60 }
 0x498   :  { %v1173_v62 = vpop.f32.mrf.mxu0 }
 0x499   :  { %1216 = vpow2.f32 %v1046_v61 }
 0x49d   :  { %v1215_v63 = vpop.eup %1214 }
 0x49e   :  { %v883_v1 = vadd.f32 1.0, %v1215_v63 }
 0x4a0   :  { %1218 = vrcp.f32 %v883_v1 }
 0x4a6   :  { %v1217_v2 = vpop.eup %1216 }
 0x4a7   :  { %v890_v4 = vadd.f32 1.0, %v1217_v2 }
 0x4a9   :  { %1220 = vrcp.f32 %v890_v4 }
 0x4ad   :  { %v1219_v8 = vpop.eup %1218 }
 0x4ae   :  { %v893_v10 = vmul.f32 %v1219_v8, %v876_v6 }
 0x4b0   :  { %v894_v11 = vadd.f32 %v893_v10, %v647_v9 }
 0x4b2   :  { %1222 = vtanh.f32 %v894_v11 }
 0x4b6   :  { %v1221_v12 = vpop.eup %1220 }
 0x4b7   :  { %v896_v13 = vsub.f32 1.0, %v1221_v12  ;;  %v898_v16 = vmul.f32 %v1221_v12, %v1722_v5 }
 0x4bf   :  { %v1223_v14 = vpop.eup %1222 }
 0x4c0   :  { %v897_v15 = vmul.f32 %v1223_v14, %v896_v13 }
 0x4c2   :  { %v899_v17 = vadd.f32 %v898_v16, %v897_v15 }
 0x4c4   :  { %1183 = vmatmul.mubr.msk.f32.vlgmr.msra.gmra.mxu1 %vm227_vm1, %v899_v17  ;;  %986 = vst.msk [vmem:[#allocation21] sm:$0x3] %vm984_vm5, %v899_v17 }
 0x4c5   :  { %1455 = shalt.err (!%p1452_p3)
}
 0x4c6   :  { %1007 = dma.vmem_to_hbm [thread:$0]  %s1005_s6, 32, %s1852_s20, [#allocation22]  }
 0x4c7   :  { %s1539_s1 = smov [#allocation23]  }
 0x4c8   :  { %s1014_s2 = sshll.u32 %s1539_s1, 4  ;;  %s1015_s2 = int_to_ptr.vmem [resolvable:$true] %s1014_s2 }
 0x4c9   :  { %s1464_s15 = scalar_lea.vmem %s1015_s2, 32  ;;  %p1469_p5 = scmp.lt.s32.totalorder %s1015_s2, %s1015_s2 }
 0x4ca   :  { %p1465_p4 = scmp.ne.s32.totalorder %s1015_s2, %s1464_s15  ;;  %p1470_p6 = scmp.lt.s32.totalorder %s1464_s15, %s1464_s15 }
 0x4cc   :  { %p1471_p7 = por %p1470_p6, %p1469_p5 }
 0x4ce   :  { %p1472_p8 = pnand %p1471_p7, %p1465_p4 }
 0x4d0   :  { %1475 = shalt.err (!%p1472_p8)
}
 0x4d1   :  { %1017 = dma.vmem_to_hbm [thread:$0]  %s1015_s2, 32, %s1853_s21, [#allocation22]   ;;  %v1047_v5 = vld [vmem:[%s1850_s18] ss:$0 sm:$0xff] }
 0x4d2   :  { %s1540_s8 = smov [#allocation20]  }
 0x4d3   :  { %s994_s20 = sshll.u32 %s1540_s8, 4  ;;  %s995_s20 = int_to_ptr.vmem [resolvable:$true] %s994_s20 }
 0x4d4   :  { %s1484_s22 = scalar_lea.vmem %s995_s20, 32  ;;  %p1489_p10 = scmp.lt.s32.totalorder %s995_s20, %s995_s20 }
 0x4d5   :  { %p1485_p9 = scmp.ne.s32.totalorder %s995_s20, %s1484_s22  ;;  %p1490_p11 = scmp.lt.s32.totalorder %s1484_s22, %s1484_s22 }
 0x4d7   :  { %p1491_p12 = por %p1490_p11, %p1489_p10 }
 0x4d9   :  { %p1492_p13 = pnand %p1491_p12, %p1485_p9 }
 0x584   :  { %v980_v18 = vpop.f32.mrf.mxu1 }
 0x585   :  { %v981_v19 = vadd.f32 %v1047_v5, %v980_v18 }
 0x586   :  { %v1184_v20 = vpop.f32.mrf.mxu1 }
 0x587   :  { %985 = vst.msk [vmem:[#allocation20] sm:$0x3] %vm984_vm5, %v981_v19 }
 0x588   :  { %1495 = shalt.err (!%p1492_p13)
}
 0x589   :  { %997 = dma.vmem_to_hbm [thread:$0]  %s995_s20, 32, %s1851_s19, [#allocation4]  }
 0x58a   :  { %1516 = dma.done.wait [#allocation4], 32  }
 0x58b   :  { %1517 = vsyncadd [#allocation4], 4294967264 }
 0x58c   :  { %1518 = dma.done.wait [#allocation22], 64  }
 0x58d   :  { %1519 = vsyncadd [#allocation22], 4294967232 }
 0x58e   :  { %1027 = vsyncpa [#allocation3], 1 }
 0x58f   :  { %1028 = vsyncpa [#allocation6], 1 }
 0x590   :  { %1029 = vsyncpa [#allocation9], 1 }
 0x591   :  { %1030 = vsyncpa [#allocation12], 1 }
 0x592   :  { %1031 = vsyncpa [#allocation15], 1 }
 0x593   :  { %1032 = vsyncpa [#allocation18], 1 }
 0x594   :  { %1033 = vsyncpa [#allocation4], 1 }
 0x595   :  { %1034 = vsyncpa [#allocation22], 1 }

</bundles_post_ra>
